<compile_context>
chip_gen: v5e
topology: v5e:2x2
jax: 0.10.0
libtpu: 0.0.40
codegen_flags: <defaults>
</compile_context>

<pallas_src>
import jax
import jax.numpy as jnp
from jax.experimental import pallas as pl
from jax.experimental.pallas import tpu as pltpu

LN_EPS = 1e-5


def _round_up(x, m):
    return ((x + m - 1) // m) * m


def _pick_tm(rows, tm):
    # Largest row tile that is a multiple of 8, capped at 256 (fits comfortably
    # in VMEM double-buffered even on v7x's 64 MiB for dim up to a few K).
    if tm is None:
        tm = 256
    tm = min(tm, _round_up(rows, 8))
    return max(8, _round_up(tm, 8))


def _pad2d(x, rpad, cpad):
    """Zero-pad a 2-D array; no-op (no copy) when already aligned."""
    if rpad == 0 and cpad == 0:
        return x
    return jnp.pad(x, ((0, rpad), (0, cpad)))


# ----------------------------------------------------------------------------
# Fused kernel:  out_tile = LayerNorm(x_tile) @ W_t + b
# ----------------------------------------------------------------------------
def _make_fused_prenorm_linear_kernel(dim_true, dim_pad, eps):
    need_mask = dim_pad != dim_true
    inv_dim = 1.0 / float(dim_true)

    def kernel(x_ref, gamma_ref, beta_ref, wt_ref, b_ref, o_ref):
        x = x_ref[...].astype(jnp.float32)                        # [tm, dim_pad]
        if need_mask:
            lane = jax.lax.broadcasted_iota(jnp.int32, x.shape, 1)
            mask = lane < dim_true
            x = jnp.where(mask, x, 0.0)
        mean = jnp.sum(x, axis=-1, keepdims=True) * inv_dim
        xc = x - mean
        if need_mask:
            xc = jnp.where(mask, xc, 0.0)
        var = jnp.sum(xc * xc, axis=-1, keepdims=True) * inv_dim   # biased (PyTorch)
        y = xc * jax.lax.rsqrt(var + eps)
        y = y * gamma_ref[...].astype(jnp.float32) + beta_ref[...].astype(jnp.float32)
        # Padded lanes of y may be nonzero (beta broadcast), but the matching
        # rows of W^T are zero-padded, so the MXU contraction stays exact.
        if need_mask:
            y = jnp.where(mask, y, 0.0)
        out = jnp.dot(y, wt_ref[...].astype(jnp.float32),
                      preferred_element_type=jnp.float32)          # MXU, f32 acc
        out = out + b_ref[...].astype(jnp.float32)
        o_ref[...] = out.astype(o_ref.dtype)

    return kernel


def _fused_prenorm_linear_prepadded(x2d, gamma, beta, wt_p, b_p, dim_out,
                                    *, eps=LN_EPS, tm=None):
    """out = LayerNorm(x2d) @ W^T + b, one pallas_call, row-tiled.

    `wt_p`  : pre-transposed, zero-padded weight  [dim_p, dout_p]
    `b_p`   : zero-padded bias                    [1, dout_p]
    `gamma`/`beta`: TRUE-dim affine params        [dim]
    """
    rows, dim = x2d.shape
    dim_p, dout_p = wt_p.shape
    tm = _pick_tm(rows, tm)
    rows_p = _round_up(rows, tm)

    x_p = _pad2d(x2d, rows_p - rows, dim_p - dim)
    gamma_p = _pad2d(gamma.reshape(1, dim), 0, dim_p - dim)
    beta_p = _pad2d(beta.reshape(1, dim), 0, dim_p - dim)

    kernel = _make_fused_prenorm_linear_kernel(dim, dim_p, eps)

    # NOTE: W is held VMEM-resident across all row tiles (index_map -> (0,0)).
    # For very large dim/dim_out, add K/N tiling with an f32 accumulator and
    # raise pltpu.CompilerParams(vmem_limit_bytes=...) as needed.
    out_p = pl.pallas_call(
        kernel,
        out_shape=jax.ShapeDtypeStruct((rows_p, dout_p), x2d.dtype),
        grid_spec=pltpu.PrefetchScalarGridSpec(
            num_scalar_prefetch=0,
            grid=(rows_p // tm,),
            in_specs=[
                pl.BlockSpec((tm, dim_p), lambda i: (i, 0)),       # x tile
                pl.BlockSpec((1, dim_p), lambda i: (0, 0)),        # gamma (resident)
                pl.BlockSpec((1, dim_p), lambda i: (0, 0)),        # beta  (resident)
                pl.BlockSpec((dim_p, dout_p), lambda i: (0, 0)),   # W^T   (resident)
                pl.BlockSpec((1, dout_p), lambda i: (0, 0)),       # bias  (resident)
            ],
            out_specs=pl.BlockSpec((tm, dout_p), lambda i: (i, 0)),
        ),
        compiler_params=pltpu.CompilerParams(
            dimension_semantics=("parallel",),   # megacore-shardable
        ),
    )(x_p, gamma_p, beta_p, wt_p, b_p)

    return out_p[:rows, :dim_out]


def fused_prenorm_linear(x2d, gamma, beta, w_t, b, *, eps=LN_EPS, tm=None):
    """Convenience wrapper taking un-padded w_t [dim_in, dim_out] and b [dim_out]."""
    dim, dim_out = w_t.shape
    dim_p = _round_up(dim, 128)
    dout_p = _round_up(dim_out, 128)
    wt_p = _pad2d(w_t, dim_p - dim, dout_p - dim_out)
    b_p = _pad2d(b.reshape(1, dim_out), 0, dout_p - dim_out)
    return _fused_prenorm_linear_prepadded(x2d, gamma, beta, wt_p, b_p, dim_out,
                                           eps=eps, tm=tm)


# ----------------------------------------------------------------------------
# Standalone LayerNorm kernel (generic-fn path), row-tiled
# ----------------------------------------------------------------------------
def _make_layernorm_kernel(dim_true, dim_pad, eps):
    need_mask = dim_pad != dim_true
    inv_dim = 1.0 / float(dim_true)

    def kernel(x_ref, gamma_ref, beta_ref, o_ref):
        x = x_ref[...].astype(jnp.float32)
        if need_mask:
            lane = jax.lax.broadcasted_iota(jnp.int32, x.shape, 1)
            mask = lane < dim_true
            x = jnp.where(mask, x, 0.0)
        mean = jnp.sum(x, axis=-1, keepdims=True) * inv_dim
        xc = x - mean
        if need_mask:
            xc = jnp.where(mask, xc, 0.0)
        var = jnp.sum(xc * xc, axis=-1, keepdims=True) * inv_dim
        y = xc * jax.lax.rsqrt(var + eps)
        y = y * gamma_ref[...].astype(jnp.float32) + beta_ref[...].astype(jnp.float32)
        o_ref[...] = y.astype(o_ref.dtype)

    return kernel


def layernorm(x2d, gamma, beta, *, eps=LN_EPS, tm=None):
    rows, dim = x2d.shape
    dim_p = _round_up(dim, 128)
    tm = _pick_tm(rows, tm)
    rows_p = _round_up(rows, tm)

    x_p = _pad2d(x2d, rows_p - rows, dim_p - dim)
    gamma_p = _pad2d(gamma.reshape(1, dim), 0, dim_p - dim)
    beta_p = _pad2d(beta.reshape(1, dim), 0, dim_p - dim)

    kernel = _make_layernorm_kernel(dim, dim_p, eps)

    out_p = pl.pallas_call(
        kernel,
        out_shape=jax.ShapeDtypeStruct((rows_p, dim_p), x2d.dtype),
        grid_spec=pltpu.PrefetchScalarGridSpec(
            num_scalar_prefetch=0,
            grid=(rows_p // tm,),
            in_specs=[
                pl.BlockSpec((tm, dim_p), lambda i: (i, 0)),
                pl.BlockSpec((1, dim_p), lambda i: (0, 0)),
                pl.BlockSpec((1, dim_p), lambda i: (0, 0)),
            ],
            out_specs=pl.BlockSpec((tm, dim_p), lambda i: (i, 0)),
        ),
        compiler_params=pltpu.CompilerParams(
            dimension_semantics=("parallel",),
        ),
    )(x_p, gamma_p, beta_p)

    return out_p[:rows, :dim]


# ----------------------------------------------------------------------------
# Standalone Linear kernel (demo `fn` when used outside the fused path)
# ----------------------------------------------------------------------------
def _linear_kernel(x_ref, wt_ref, b_ref, o_ref):
    x = x_ref[...].astype(jnp.float32)                  # [tm, dim_in_p]
    wt = wt_ref[...].astype(jnp.float32)                # [dim_in_p, dim_out_p] (pre-T)
    y = jnp.dot(x, wt, preferred_element_type=jnp.float32)
    y = y + b_ref[...].astype(jnp.float32)
    o_ref[...] = y.astype(o_ref.dtype)


def _linear_prepadded(x2d, wt_p, b_p, dim_out, *, tm=None):
    rows, dim = x2d.shape
    dim_p, dout_p = wt_p.shape
    tm = _pick_tm(rows, tm)
    rows_p = _round_up(rows, tm)

    x_p = _pad2d(x2d, rows_p - rows, dim_p - dim)

    out_p = pl.pallas_call(
        _linear_kernel,
        out_shape=jax.ShapeDtypeStruct((rows_p, dout_p), x2d.dtype),
        grid_spec=pltpu.PrefetchScalarGridSpec(
            num_scalar_prefetch=0,
            grid=(rows_p // tm,),
            in_specs=[
                pl.BlockSpec((tm, dim_p), lambda i: (i, 0)),
                pl.BlockSpec((dim_p, dout_p), lambda i: (0, 0)),   # W resident
                pl.BlockSpec((1, dout_p), lambda i: (0, 0)),
            ],
            out_specs=pl.BlockSpec((tm, dout_p), lambda i: (i, 0)),
        ),
        compiler_params=pltpu.CompilerParams(
            dimension_semantics=("parallel",),
        ),
    )(x_p, wt_p, b_p)

    return out_p[:rows, :dim_out]


# ----------------------------------------------------------------------------
# Module wrappers
# ----------------------------------------------------------------------------
class PallasLinear:
    """y = x @ W^T + b.  W is transposed AND lane-padded ONCE here (static
    weight), so the kernel never transposes and the wrapper never re-pads the
    big weight per forward call."""

    def __init__(self, w, b):
        w = jnp.asarray(w)                    # [dim_out, dim_in] (PyTorch layout)
        b = jnp.asarray(b)                    # [dim_out]
        self.dim_in = w.shape[1]
        self.dim_out = w.shape[0]
        dim_p = _round_up(self.dim_in, 128)
        dout_p = _round_up(self.dim_out, 128)
        w_t = w.T                             # [dim_in, dim_out]
        self.w_t_p = _pad2d(w_t, dim_p - self.dim_in, dout_p - self.dim_out)
        self.b_p = _pad2d(b.reshape(1, self.dim_out), 0, dout_p - self.dim_out)

    def __call__(self, x):
        lead = x.shape[:-1]
        out = _linear_prepadded(x.reshape(-1, self.dim_in),
                                self.w_t_p, self.b_p, self.dim_out)
        return out.reshape(lead + (self.dim_out,))


class PreNorm:
    """PreNorm.forward(x, **kw) == fn(LayerNorm(x), **kw).
    If `fn` is a PallasLinear (and no kwargs), LayerNorm+Linear run fused in a
    single pallas_call; otherwise the tiled LayerNorm kernel runs and `fn` is
    applied to its output."""

    def __init__(self, dim, fn):
        self.dim = dim
        # nn.LayerNorm default init: weight=1, bias=0
        self.gamma = jnp.ones((dim,), jnp.float32)
        self.beta = jnp.zeros((dim,), jnp.float32)
        self.fn = fn

    def __call__(self, x, **kwargs):
        lead = x.shape[:-1]
        x2d = x.reshape(-1, self.dim)
        if isinstance(self.fn, PallasLinear) and not kwargs:
            out = _fused_prenorm_linear_prepadded(
                x2d, self.gamma, self.beta,
                self.fn.w_t_p, self.fn.b_p, self.fn.dim_out)
            return out.reshape(lead + (self.fn.dim_out,))
        normed = layernorm(x2d, self.gamma, self.beta)
        return self.fn(normed.reshape(lead + (self.dim,)), **kwargs)


if __name__ == "__main__":
    batch, seq, dim = 2, 64, 128            # rows = 128 -> one 128-row tile
    key = jax.random.PRNGKey(0)
    kx, kw, kb, kg, kbe = jax.random.split(key, 5)

    x = jax.random.normal(kx, (batch, seq, dim), dtype=jnp.float32)
    w = jax.random.normal(kw, (dim, dim), dtype=jnp.float32) * 0.02
    b = jax.random.normal(kb, (dim,), dtype=jnp.float32) * 0.02

    prenorm = PreNorm(dim, PallasLinear(w, b))
    # non-trivial affine params to exercise the gamma/beta path
    prenorm.gamma = 1.0 + 0.1 * jax.random.normal(kg, (dim,), jnp.float32)
    prenorm.beta = 0.1 * jax.random.normal(kbe, (dim,), jnp.float32)

    # fused fast path (LayerNorm + Linear in one pallas_call)
    out = jax.block_until_ready(prenorm(x))

    # generic path (arbitrary fn -> standalone LayerNorm kernel + Linear kernel)
    lin = PallasLinear(w, b)
    generic = PreNorm(dim, lambda y: lin(y))
    generic.gamma, generic.beta = prenorm.gamma, prenorm.beta
    out2 = jax.block_until_ready(generic(x))

    # plain-JAX reference
    mean = jnp.mean(x, axis=-1, keepdims=True)
    var = jnp.mean((x - mean) ** 2, axis=-1, keepdims=True)
    ref = (x - mean) * jax.lax.rsqrt(var + 1e-5) * prenorm.gamma + prenorm.beta
    ref = ref @ w.T + b

    assert out.shape == (batch, seq, dim)
    assert jnp.allclose(out, ref, atol=1e-4, rtol=1e-4)
    assert jnp.allclose(out2, ref, atol=1e-4, rtol=1e-4)

    print("KERNEL_OK")
</pallas_src>

<mosaic_0001>
module attributes {stable_mosaic.version = 11 : i64} {
  func.func @kernel(%arg0: i32, %arg1: memref<128x128xf32, #tpu.memory_space<vmem>>, %arg2: memref<1x128xf32, #tpu.memory_space<vmem>>, %arg3: memref<1x128xf32, #tpu.memory_space<vmem>>, %arg4: memref<128x128xf32, #tpu.memory_space<vmem>>, %arg5: memref<1x128xf32, #tpu.memory_space<vmem>>, %arg6: memref<128x128xf32, #tpu.memory_space<vmem>>) attributes {dimension_semantics = [#tpu.dimension_semantics<parallel>], iteration_bounds = array<i64: 1>, scalar_prefetch = 0 : i64, scratch_operands = 0 : i64, tpu.core_type = #tpu.core_type<tc>, window_params = [{transform_indices = @transform_0, window_bounds = array<i64: 128, 128>}, {pipeline_mode = #tpu.pipeline_mode<synchronous>, transform_indices = @transform_1, window_bounds = array<i64: 1, 128>}, {pipeline_mode = #tpu.pipeline_mode<synchronous>, transform_indices = @transform_2, window_bounds = array<i64: 1, 128>}, {pipeline_mode = #tpu.pipeline_mode<synchronous>, transform_indices = @transform_3, window_bounds = array<i64: 128, 128>}, {pipeline_mode = #tpu.pipeline_mode<synchronous>, transform_indices = @transform_4, window_bounds = array<i64: 1, 128>}, {transform_indices = @transform_5, window_bounds = array<i64: 128, 128>}]} {
    %c0 = arith.constant 0 : index
    %c0_0 = arith.constant 0 : index
    %0 = vector.load %arg1[%c0, %c0_0] : memref<128x128xf32, #tpu.memory_space<vmem>>, vector<128x128xf32>
    %cst = arith.constant dense<0.000000e+00> : vector<128xf32>
    %1 = vector.multi_reduction <add>, %0, %cst [1] : vector<128x128xf32> to vector<128xf32>
    %2 = vector.shape_cast %1 : vector<128xf32> to vector<128x1xf32>
    %cst_1 = arith.constant 7.812500e-03 : f32
    %3 = vector.broadcast %cst_1 : f32 to vector<128x1xf32>
    %4 = arith.mulf %2, %3 : vector<128x1xf32>
    %5 = vector.broadcast %4 : vector<128x1xf32> to vector<128x128xf32>
    %6 = arith.subf %0, %5 : vector<128x128xf32>
    %7 = arith.mulf %6, %6 : vector<128x128xf32>
    %cst_2 = arith.constant dense<0.000000e+00> : vector<128xf32>
    %8 = vector.multi_reduction <add>, %7, %cst_2 [1] : vector<128x128xf32> to vector<128xf32>
    %9 = vector.shape_cast %8 : vector<128xf32> to vector<128x1xf32>
    %cst_3 = arith.constant 7.812500e-03 : f32
    %10 = vector.broadcast %cst_3 : f32 to vector<128x1xf32>
    %11 = arith.mulf %9, %10 : vector<128x1xf32>
    %cst_4 = arith.constant 9.99999974E-6 : f32
    %12 = vector.broadcast %cst_4 : f32 to vector<128x1xf32>
    %13 = arith.addf %11, %12 : vector<128x1xf32>
    %14 = math.rsqrt %13 : vector<128x1xf32>
    %15 = vector.broadcast %14 : vector<128x1xf32> to vector<128x128xf32>
    %16 = arith.mulf %6, %15 : vector<128x128xf32>
    %c0_5 = arith.constant 0 : index
    %c0_6 = arith.constant 0 : index
    %17 = vector.load %arg2[%c0_5, %c0_6] : memref<1x128xf32, #tpu.memory_space<vmem>>, vector<1x128xf32>
    %18 = vector.broadcast %17 : vector<1x128xf32> to vector<128x128xf32>
    %19 = arith.mulf %16, %18 : vector<128x128xf32>
    %c0_7 = arith.constant 0 : index
    %c0_8 = arith.constant 0 : index
    %20 = vector.load %arg3[%c0_7, %c0_8] : memref<1x128xf32, #tpu.memory_space<vmem>>, vector<1x128xf32>
    %21 = vector.broadcast %20 : vector<1x128xf32> to vector<128x128xf32>
    %22 = arith.addf %19, %21 : vector<128x128xf32>
    %c0_9 = arith.constant 0 : index
    %c0_10 = arith.constant 0 : index
    %23 = vector.load %arg4[%c0_9, %c0_10] : memref<128x128xf32, #tpu.memory_space<vmem>>, vector<128x128xf32>
    %cst_11 = arith.constant dense<0.000000e+00> : vector<128x128xf32>
    %24 = tpu.matmul %22, %23, %cst_11 {dimension_numbers = #tpu.dot_dimension_numbers<[1], [0], [0], [1], [0, 0, 1, 1], [], []>} : vector<128x128xf32>, vector<128x128xf32>, vector<128x128xf32> -> vector<128x128xf32>
    %c0_12 = arith.constant 0 : index
    %c0_13 = arith.constant 0 : index
    %25 = vector.load %arg5[%c0_12, %c0_13] : memref<1x128xf32, #tpu.memory_space<vmem>>, vector<1x128xf32>
    %26 = vector.broadcast %25 : vector<1x128xf32> to vector<128x128xf32>
    %27 = arith.addf %24, %26 : vector<128x128xf32>
    %c0_14 = arith.constant 0 : index
    %c0_15 = arith.constant 0 : index
    %28 = vector.load %arg6[%c0_14, %c0_15] : memref<128x128xf32, #tpu.memory_space<vmem>>, vector<128x128xf32>
    tpu.vector_store %arg6[%c0_14, %c0_15], %27 {strides = array<i32>} : memref<128x128xf32, #tpu.memory_space<vmem>>, vector<128x128xf32>,
    return
  }
  func.func @transform_0(%arg0: i32) -> (i32, i32) {
    %c0_i32 = arith.constant 0 : i32
    %c0_i32_0 = arith.constant 0 : i32
    return %arg0, %c0_i32 : i32, i32
  }
  func.func @transform_1(%arg0: i32) -> (i32, i32) {
    %c0_i32 = arith.constant 0 : i32
    %c0_i32_0 = arith.constant 0 : i32
    %c0_i32_1 = arith.constant 0 : i32
    return %c0_i32, %c0_i32_0 : i32, i32
  }
  func.func @transform_2(%arg0: i32) -> (i32, i32) {
    %c0_i32 = arith.constant 0 : i32
    %c0_i32_0 = arith.constant 0 : i32
    %c0_i32_1 = arith.constant 0 : i32
    return %c0_i32, %c0_i32_0 : i32, i32
  }
  func.func @transform_3(%arg0: i32) -> (i32, i32) {
    %c0_i32 = arith.constant 0 : i32
    %c0_i32_0 = arith.constant 0 : i32
    %c0_i32_1 = arith.constant 0 : i32
    return %c0_i32, %c0_i32_0 : i32, i32
  }
  func.func @transform_4(%arg0: i32) -> (i32, i32) {
    %c0_i32 = arith.constant 0 : i32
    %c0_i32_0 = arith.constant 0 : i32
    %c0_i32_1 = arith.constant 0 : i32
    return %c0_i32, %c0_i32_0 : i32, i32
  }
  func.func @transform_5(%arg0: i32) -> (i32, i32) {
    %c0_i32 = arith.constant 0 : i32
    %c0_i32_0 = arith.constant 0 : i32
    return %arg0, %c0_i32 : i32, i32
  }
}

</mosaic_0001>

<bundles_post_ra>
// kernel: tpu_custom_call.1
= control target key start
LH: loop header
LB: loop body
LE: loop exit
PB: predicated region body
PF: predicated region fallthrough
CT: control target
= control target key end

     0   :  { %10 = vsyncpa [#allocation3], 0  ;;  %s1269_s0 = inlined_call_operand.hbm [shape: f32[128,128], index: 0, kind: input, shape index: {}]   ;;  %s1270_s1 = inlined_call_operand.hbm [shape: f32[1,128], index: 1, kind: input, shape index: {}]   ;;  %s1271_s2 = inlined_call_operand.vmem [shape: f32[1,128], index: 2, kind: input, shape index: {}]   ;;  %s1272_s3 = inlined_call_operand.hbm [shape: f32[128,128], index: 3, kind: input, shape index: {}]   ;;  %s1273_s4 = inlined_call_operand.vmem [shape: f32[1,128], index: 4, kind: input, shape index: {}]   ;;  %s1274_s5 = inlined_call_operand.hbm [shape: f32[128,128], index: 5, kind: output, shape index: {}]  }
   0x1   :  { %11 = vsyncpa [#allocation6], 0  ;;  %s31_s20 = sshll.u32 %s1270_s1, 4  ;;  %s32_s20 = int_to_ptr.hbm [resolvable:$true] %s31_s20 }
   0x2   :  { %12 = vsyncpa [#allocation4], 0  ;;  %s754_s21 = smov [#allocation5]   ;;  %s17_s25 = sshll.u32 %s1269_s0, 4  ;;  %s18_s25 = int_to_ptr.hbm [resolvable:$true] %s17_s25 }
   0x3   :  { %s33_s22 = sshll.u32 %s754_s21, 4  ;;  %s755_s26 = smov [#allocation2]   ;;  %s34_s22 = int_to_ptr.vmem [resolvable:$true] %s33_s22 }
   0x4   :  { %36 = dma.hbm_to_vmem [thread:$0]  %s32_s20, 16, %s34_s22, [#allocation6]  }
   0x5   :  { %s19_s27 = sshll.u32 %s755_s26, 4  ;;  %s756_s28 = smov 128   ;;  %s20_s27 = int_to_ptr.vmem [resolvable:$true] %s19_s27 }
   0x6   :  { %s757_s29 = smov 8   ;;  %s43_s6 = sshll.u32 %s1272_s3, 4  ;;  %s44_s6 = int_to_ptr.hbm [resolvable:$true] %s43_s6 }
   0x7   :  { %25 = dma.hbm_to_vmem [thread:$0]  %s18_s25, 2048, %s20_s27, [#allocation3], %s756_s28, %s756_s28, %s757_s29  }
   0x8   :  { %s758_s7 = smov [#allocation7]  }
   0x9   :  { %s45_s8 = sshll.u32 %s758_s7, 4  ;;  %s46_s8 = int_to_ptr.vmem [resolvable:$true] %s45_s8 }
   0xa   :  { %51 = dma.hbm_to_vmem [thread:$0]  %s44_s6, 2048, %s46_s8, [#allocation6], %s756_s28, %s756_s28, %s757_s29  }
   0xb   :  { %748 = dma.done.wait [#allocation3], 2048  }
   0xc   :  { %749 = vsyncadd [#allocation3], 4294965248 }
   0xd   :  { %750 = dma.done.wait [#allocation6], 2064  }
   0xe   :  { %751 = vsyncadd [#allocation6], 4294965232  ;;  %v805_v0 = vld [vmem:[#allocation2 + $0x48] sm:$0xff]  ;;  %v74_v1 = vld [vmem:[#allocation2 + $0x40] sm:$0xff]  ;;  %s549_s13 = sshll.u32 %s1274_s5, 4  ;;  %s550_s13 = int_to_ptr.hbm [resolvable:$true] %s549_s13 }
   0xf   :  { %v66_v2 = vld [vmem:[#allocation2] sm:$0xff]  ;;  %100 = vadd.xlane.f32.xlu2 %v805_v0  ;;  %98 = vadd.xlane.f32.xlu0 %v74_v1  ;;  %v79_v3 = vld [vmem:[#allocation2 + $0x68] sm:$0xff]  ;;  %v76_v6 = vld [vmem:[#allocation2 + $0x50] sm:$0xff] }
  0x10   :  { %82 = vadd.xlane.f32.xlu1 %v66_v2  ;;  %v78_v4 = vld [vmem:[#allocation2 + $0x60] sm:$0xff]  ;;  %v67_v7 = vld [vmem:[#allocation2 + $0x8] sm:$0xff]  ;;  %v811_v9 = vld [vmem:[#allocation2 + $0x30] sm:$0xff] }
  0x11   :  { %v70_v5 = vld [vmem:[#allocation2 + $0x20] sm:$0xff]  ;;  %v808_v8 = vld [vmem:[#allocation2 + $0x28] sm:$0xff]  ;;  %v813_v10 = vld [vmem:[#allocation2 + $0x70] sm:$0xff] }
  0x12   :  { %v815_v11 = vld [vmem:[#allocation2 + $0x10] sm:$0xff]  ;;  %v820_v12 = vld [vmem:[#allocation2 + $0x18] sm:$0xff] }
  0x13   :  { %v822_v13 = vld [vmem:[#allocation2 + $0x58] sm:$0xff] }
  0x14   :  { %v824_v14 = vld [vmem:[#allocation2 + $0x78] sm:$0xff] }
  0x15   :  { %v829_v15 = vld [vmem:[#allocation2 + $0x38] sm:$0xff] }
  0x16   :  { %v457_v40 = vld [vmem:[#allocation7 + $0x78] sm:$0xff]  ;;  %v456_v41 = vld [vmem:[#allocation7 + $0x70] sm:$0xff] }
  0x17   :  { %108 = vadd.xlane.f32.xlu2 %v79_v3  ;;  %106 = vadd.xlane.f32.xlu0 %v78_v4 }
  0x18   :  { %90 = vadd.xlane.f32.xlu1 %v70_v5  ;;  %462 = vmatpush.msra.mxu0 %v457_v40 }
  0x19   :  { %564 = vmatpush.msra.mxu2 %v457_v40  ;;  %563 = vmatpush.msra.mxu1 %v457_v40 }
  0x1a   :  { %565 = vmatpush.msra.mxu3 %v457_v40  ;;  %463 = vmatpush.msra.mxu0 %v456_v41 }
  0x1b   :  { %567 = vmatpush.msra.mxu2 %v456_v41  ;;  %566 = vmatpush.msra.mxu1 %v456_v41 }
  0x1c   :  { %568 = vmatpush.msra.mxu3 %v456_v41 }
  0x1f   :  { %102 = vadd.xlane.f32.xlu2 %v76_v6  ;;  %84 = vadd.xlane.f32.xlu0 %v67_v7 }
  0x20   :  { %92 = vadd.xlane.f32.xlu1 %v808_v8 }
  0x27   :  { %94 = vadd.xlane.f32.xlu2 %v811_v9  ;;  %110 = vadd.xlane.f32.xlu0 %v813_v10 }
  0x28   :  { %86 = vadd.xlane.f32.xlu1 %v815_v11 }
  0x2f   :  { %88 = vadd.xlane.f32.xlu2 %v820_v12  ;;  %104 = vadd.xlane.f32.xlu0 %v822_v13 }
  0x30   :  { %112 = vadd.xlane.f32.xlu1 %v824_v14 }
  0x37   :  { %96 = vadd.xlane.f32.xlu0 %v829_v15 }
  0x82   :  { %v101_v16 = vpop.xlane.xlu2 %100  ;;  %v99_v17 = vpop.xlane.xlu0 %98 }
  0x83   :  { %v122_v18 = vmul.f32 0.0078125, %v99_v17  ;;  %v83_v19 = vpop.xlane.xlu1 %82  ;;  %v123_v34 = vmul.f32 0.0078125, %v101_v16 }
  0x84   :  { %v114_v20 = vmul.f32 0.0078125, %v83_v19 }
  0x85   :  { %v832_v21 = vsub.f32 %v74_v1, %v122_v18  ;;  %v853_v42 = vsub.f32 %v805_v0, %v123_v34  ;;  %v444_v34 = vld [vmem:[#allocation7 + $0x10] sm:$0xff] }
  0x86   :  { %v834_v22 = vsub.f32 %v66_v2, %v114_v20  ;;  %v455_v20 = vld [vmem:[#allocation7 + $0x68] sm:$0xff] }
  0x87   :  { %v154_v23 = vmul.f32 %v832_v21, %v832_v21  ;;  %v155_v49 = vmul.f32 %v853_v42, %v853_v42  ;;  %464 = vmatpush.msra.mxu0 %v455_v20  ;;  %570 = vmatpush.msra.mxu2 %v455_v20 }
  0x88   :  { %v146_v24 = vmul.f32 %v834_v22, %v834_v22  ;;  %569 = vmatpush.msra.mxu1 %v455_v20  ;;  %571 = vmatpush.msra.mxu3 %v455_v20 }
  0x89   :  { %178 = vadd.xlane.f32.xlu1 %v154_v23  ;;  %v453_v23 = vld [vmem:[#allocation7 + $0x58] sm:$0xff] }
  0x8a   :  { %162 = vadd.xlane.f32.xlu0 %v146_v24  ;;  %v109_v25 = vpop.xlane.xlu2 %108  ;;  %v107_v26 = vpop.xlane.xlu0 %106  ;;  %v451_v24 = vld [vmem:[#allocation7 + $0x48] sm:$0xff] }
  0x8b   :  { %v127_v27 = vmul.f32 0.0078125, %v109_v25  ;;  %v126_v28 = vmul.f32 0.0078125, %v107_v26  ;;  %v91_v29 = vpop.xlane.xlu1 %90  ;;  %v450_v25 = vld [vmem:[#allocation7 + $0x40] sm:$0xff]  ;;  %v449_v26 = vld [vmem:[#allocation7 + $0x38] sm:$0xff] }
  0x8c   :  { %v118_v30 = vmul.f32 0.0078125, %v91_v29  ;;  %v446_v29 = vld [vmem:[#allocation7 + $0x20] sm:$0xff] }
  0x8d   :  { %v840_v31 = vsub.f32 %v79_v3, %v127_v27  ;;  %v842_v32 = vsub.f32 %v78_v4, %v126_v28  ;;  %v448_v27 = vld [vmem:[#allocation7 + $0x30] sm:$0xff]  ;;  %v447_v28 = vld [vmem:[#allocation7 + $0x28] sm:$0xff] }
  0x8e   :  { %v844_v33 = vsub.f32 %v70_v5, %v118_v30  ;;  %v445_v30 = vld [vmem:[#allocation7 + $0x18] sm:$0xff] }
  0x8f   :  { %v158_v35 = vmul.f32 %v842_v32, %v842_v32  ;;  %v159_v36 = vmul.f32 %v840_v31, %v840_v31 }
  0x90   :  { %v150_v37 = vmul.f32 %v844_v33, %v844_v33 }
  0x91   :  { %186 = vadd.xlane.f32.xlu2 %v158_v35  ;;  %v443_v35 = vld [vmem:[#allocation7 + $0x8] sm:$0xff] }
  0x92   :  { %188 = vadd.xlane.f32.xlu0 %v159_v36  ;;  %170 = vadd.xlane.f32.xlu1 %v150_v37  ;;  %v103_v38 = vpop.xlane.xlu2 %102  ;;  %v85_v39 = vpop.xlane.xlu0 %84  ;;  %v442_v36 = vld [vmem:[#allocation7] sm:$0xff] }
  0x93   :  { %v124_v43 = vmul.f32 0.0078125, %v103_v38  ;;  %v115_v44 = vmul.f32 0.0078125, %v85_v39  ;;  %v93_v45 = vpop.xlane.xlu1 %92 }
  0x94   :  { %v119_v48 = vmul.f32 0.0078125, %v93_v45 }
  0x95   :  { %v855_v46 = vsub.f32 %v76_v6, %v124_v43  ;;  %v857_v47 = vsub.f32 %v67_v7, %v115_v44 }
  0x96   :  { %v866_v52 = vsub.f32 %v808_v8, %v119_v48 }
  0x97   :  { %v156_v50 = vmul.f32 %v855_v46, %v855_v46  ;;  %v147_v51 = vmul.f32 %v857_v47, %v857_v47 }
  0x98   :  { %v151_v60 = vmul.f32 %v866_v52, %v866_v52 }
  0x99   :  { %180 = vadd.xlane.f32.xlu2 %v155_v49 }
  0x9a   :  { %182 = vadd.xlane.f32.xlu0 %v156_v50  ;;  %164 = vadd.xlane.f32.xlu1 %v147_v51  ;;  %v95_v53 = vpop.xlane.xlu2 %94  ;;  %v111_v54 = vpop.xlane.xlu0 %110 }
  0x9b   :  { %v120_v55 = vmul.f32 0.0078125, %v95_v53  ;;  %v128_v56 = vmul.f32 0.0078125, %v111_v54  ;;  %v87_v57 = vpop.xlane.xlu1 %86 }
  0x9c   :  { %v116_v61 = vmul.f32 0.0078125, %v87_v57 }
  0x9d   :  { %v869_v58 = vsub.f32 %v811_v9, %v120_v55  ;;  %v872_v59 = vsub.f32 %v813_v10, %v128_v56 }
  0x9e   :  { %v881_v0 = vsub.f32 %v815_v11, %v116_v61 }
  0x9f   :  { %v152_v62 = vmul.f32 %v869_v58, %v869_v58  ;;  %v160_v63 = vmul.f32 %v872_v59, %v872_v59 }
  0xa0   :  { %v148_v8 = vmul.f32 %v881_v0, %v881_v0 }
  0xa1   :  { %172 = vadd.xlane.f32.xlu2 %v151_v60 }
  0xa2   :  { %174 = vadd.xlane.f32.xlu0 %v152_v62  ;;  %190 = vadd.xlane.f32.xlu1 %v160_v63  ;;  %v89_v1 = vpop.xlane.xlu2 %88  ;;  %v105_v2 = vpop.xlane.xlu0 %104 }
  0xa3   :  { %v117_v3 = vmul.f32 0.0078125, %v89_v1  ;;  %v125_v4 = vmul.f32 0.0078125, %v105_v2  ;;  %v113_v5 = vpop.xlane.xlu1 %112 }
  0xa4   :  { %v129_v9 = vmul.f32 0.0078125, %v113_v5 }
  0xa5   :  { %v884_v6 = vsub.f32 %v820_v12, %v117_v3  ;;  %v887_v7 = vsub.f32 %v822_v13, %v125_v4 }
  0xa6   :  { %v896_v16 = vsub.f32 %v824_v14, %v129_v9  ;;  %v454_v14 = vld [vmem:[#allocation7 + $0x60] sm:$0xff] }
  0xa7   :  { %v149_v10 = vmul.f32 %v884_v6, %v884_v6  ;;  %v157_v11 = vmul.f32 %v887_v7, %v887_v7  ;;  %465 = vmatpush.msra.mxu0 %v454_v14  ;;  %573 = vmatpush.msra.mxu2 %v454_v14 }
  0xa8   :  { %v161_v18 = vmul.f32 %v896_v16, %v896_v16  ;;  %572 = vmatpush.msra.mxu1 %v454_v14  ;;  %574 = vmatpush.msra.mxu3 %v454_v14 }
  0xa9   :  { %166 = vadd.xlane.f32.xlu2 %v148_v8  ;;  %466 = vmatpush.msra.mxu0 %v453_v23 }
  0xaa   :  { %168 = vadd.xlane.f32.xlu0 %v149_v10  ;;  %184 = vadd.xlane.f32.xlu1 %v157_v11  ;;  %v97_v12 = vpop.xlane.xlu0 %96 }
  0xab   :  { %v121_v17 = vmul.f32 0.0078125, %v97_v12  ;;  %576 = vmatpush.msra.mxu2 %v453_v23  ;;  %575 = vmatpush.msra.mxu1 %v453_v23 }
  0xac   :  { %577 = vmatpush.msra.mxu3 %v453_v23 }
  0xad   :  { %v899_v13 = vsub.f32 %v829_v15, %v121_v17  ;;  %v452_v15 = vld [vmem:[#allocation7 + $0x50] sm:$0xff] }
  0xae   :  { %467 = vmatpush.msra.mxu0 %v452_v15  ;;  %579 = vmatpush.msra.mxu2 %v452_v15 }
  0xaf   :  { %v153_v19 = vmul.f32 %v899_v13, %v899_v13  ;;  %578 = vmatpush.msra.mxu1 %v452_v15  ;;  %580 = vmatpush.msra.mxu3 %v452_v15 }
  0xb0   :  { %468 = vmatpush.msra.mxu0 %v451_v24  ;;  %582 = vmatpush.msra.mxu2 %v451_v24 }
  0xb1   :  { %192 = vadd.xlane.f32.xlu2 %v161_v18  ;;  %581 = vmatpush.msra.mxu1 %v451_v24 }
  0xb2   :  { %176 = vadd.xlane.f32.xlu1 %v153_v19  ;;  %583 = vmatpush.msra.mxu3 %v451_v24 }
  0xb3   :  { %469 = vmatpush.msra.mxu0 %v450_v25  ;;  %585 = vmatpush.msra.mxu2 %v450_v25 }
  0xb4   :  { %584 = vmatpush.msra.mxu1 %v450_v25  ;;  %586 = vmatpush.msra.mxu3 %v450_v25 }
  0xb5   :  { %470 = vmatpush.msra.mxu0 %v449_v26  ;;  %588 = vmatpush.msra.mxu2 %v449_v26 }
  0xb6   :  { %587 = vmatpush.msra.mxu1 %v449_v26  ;;  %589 = vmatpush.msra.mxu3 %v449_v26 }
  0xb7   :  { %471 = vmatpush.msra.mxu0 %v448_v27  ;;  %591 = vmatpush.msra.mxu2 %v448_v27 }
  0xb8   :  { %590 = vmatpush.msra.mxu1 %v448_v27  ;;  %592 = vmatpush.msra.mxu3 %v448_v27 }
  0xb9   :  { %472 = vmatpush.msra.mxu0 %v447_v28  ;;  %594 = vmatpush.msra.mxu2 %v447_v28 }
  0xba   :  { %593 = vmatpush.msra.mxu1 %v447_v28  ;;  %595 = vmatpush.msra.mxu3 %v447_v28 }
  0xbb   :  { %473 = vmatpush.msra.mxu0 %v446_v29  ;;  %597 = vmatpush.msra.mxu2 %v446_v29 }
  0xbc   :  { %596 = vmatpush.msra.mxu1 %v446_v29  ;;  %598 = vmatpush.msra.mxu3 %v446_v29 }
  0xbd   :  { %474 = vmatpush.msra.mxu0 %v445_v30  ;;  %600 = vmatpush.msra.mxu2 %v445_v30 }
  0xbe   :  { %599 = vmatpush.msra.mxu1 %v445_v30  ;;  %601 = vmatpush.msra.mxu3 %v445_v30 }
  0xbf   :  { %475 = vmatpush.msra.mxu0 %v444_v34  ;;  %603 = vmatpush.msra.mxu2 %v444_v34 }
  0xc0   :  { %602 = vmatpush.msra.mxu1 %v444_v34  ;;  %604 = vmatpush.msra.mxu3 %v444_v34 }
  0xc1   :  { %476 = vmatpush.msra.mxu0 %v443_v35  ;;  %606 = vmatpush.msra.mxu2 %v443_v35 }
  0xc2   :  { %605 = vmatpush.msra.mxu1 %v443_v35  ;;  %607 = vmatpush.msra.mxu3 %v443_v35 }
  0xc3   :  { %477 = vmatpush.msra.mxu0 %v442_v36  ;;  %609 = vmatpush.msra.mxu2 %v442_v36 }
  0xc4   :  { %608 = vmatpush.msra.mxu1 %v442_v36  ;;  %610 = vmatpush.msra.mxu3 %v442_v36 }
  0xfc   :  { %v179_v37 = vpop.xlane.xlu1 %178 }
  0xfd   :  { %v163_v38 = vpop.xlane.xlu0 %162  ;;  %v202_v39 = vmul.f32 0.0078125, %v179_v37 }
  0xfe   :  { %v194_v40 = vmul.f32 0.0078125, %v163_v38 }
  0xff   :  { %v218_v41 = vadd.f32 1e-05, %v202_v39 }
 0x100   :  { %v210_v43 = vadd.f32 1e-05, %v194_v40 }
 0x101   :  { %620 = vrsqrt.f32 %v218_v41  ;;  %vm312_vm4 = vweird.f32 %v218_v41 }
 0x102   :  { %622 = vrsqrt.f32 %v210_v43  ;;  %vm232_vm0 = vweird.f32 %v210_v43 }
 0x104   :  { %v187_v44 = vpop.xlane.xlu2 %186 }
 0x105   :  { %v206_v45 = vmul.f32 0.0078125, %v187_v44  ;;  %v189_v48 = vpop.xlane.xlu0 %188  ;;  %v171_v49 = vpop.xlane.xlu1 %170 }
 0x106   :  { %v207_v50 = vmul.f32 0.0078125, %v189_v48  ;;  %v198_v51 = vmul.f32 0.0078125, %v171_v49 }
 0x107   :  { %v905_v53 = vpop.eup %620  ;;  %v907_v54 = vadd.f32 1e-05, %v206_v45 }
 0x108   :  { %v623_v55 = vpop.eup %622  ;;  %v307_v56 = vmul.f32 %v905_v53, %v218_v41  ;;  %v910_v57 = vadd.f32 1e-05, %v207_v50  ;;  %v912_v60 = vadd.f32 1e-05, %v198_v51  ;;  %vm313_vm2 = vweird.f32 %v905_v53  ;;  %v962_v51 = vld [vmem:[#allocation5] ss:$0 sm:$0xff] }
 0x109   :  { %v227_v61 = vmul.f32 %v623_v55, %v210_v43  ;;  %624 = vrsqrt.f32 %v907_v54  ;;  %vm233_vm1 = vweird.f32 %v623_v55  ;;  %vm948_vm5 = vmor %vm312_vm4, %vm313_vm2  ;;  %vm352_vm8 = vweird.f32 %v907_v54 }
 0x10a   :  { %v308_v62 = vmul.f32 %v905_v53, %v307_v56  ;;  %626 = vrsqrt.f32 %v910_v57  ;;  %vm937_vm3 = vmor %vm232_vm0, %vm233_vm1  ;;  %vm272_vm6 = vweird.f32 %v912_v60  ;;  %vm362_vm11 = vweird.f32 %v910_v57 }
 0x10b   :  { %v228_v63 = vmul.f32 %v623_v55, %v227_v61  ;;  %628 = vrsqrt.f32 %v912_v60 }
 0x10c   :  { %v309_v1 = vmul.f32 0.5, %v308_v62  ;;  %v181_v2 = vpop.xlane.xlu2 %180 }
 0x10d   :  { %v229_v3 = vmul.f32 0.5, %v228_v63  ;;  %v203_v4 = vmul.f32 0.0078125, %v181_v2  ;;  %v183_v5 = vpop.xlane.xlu0 %182  ;;  %v165_v8 = vpop.xlane.xlu1 %164 }
 0x10e   :  { %v310_v9 = vsub.f32 1.5, %v309_v1  ;;  %v204_v10 = vmul.f32 0.0078125, %v183_v5  ;;  %v195_v18 = vmul.f32 0.0078125, %v165_v8 }
 0x10f   :  { %v918_v11 = vpop.eup %624  ;;  %v230_v12 = vsub.f32 1.5, %v229_v3  ;;  %v920_v17 = vadd.f32 1e-05, %v203_v4 }
 0x110   :  { %v922_v19 = vpop.eup %626  ;;  %v347_v20 = vmul.f32 %v918_v11, %v907_v54  ;;  %v926_v14 = vadd.f32 1e-05, %v204_v10  ;;  %v311_v25 = vmul.f32 %v905_v53, %v310_v9  ;;  %v942_v28 = vadd.f32 1e-05, %v195_v18 }
 0x111   :  { %v928_v23 = vpop.eup %628  ;;  %v231_v15 = vmul.f32 %v623_v55, %v230_v12  ;;  %v357_v24 = vmul.f32 %v922_v19, %v910_v57  ;;  %630 = vrsqrt.f32 %v920_v17  ;;  %vm353_vm7 = vweird.f32 %v918_v11 }
 0x112   :  { %v267_v26 = vmul.f32 %v928_v23, %v912_v60  ;;  %632 = vrsqrt.f32 %v926_v14  ;;  %v348_v29 = vmul.f32 %v918_v11, %v347_v20  ;;  %v315_v44 = vsel %vm948_vm5, %v905_v53, %v311_v25  ;;  %v974_v53 = vld [vmem:[%s1271_s2] ss:$0 sm:$0xff]  ;;  %vm354_vm4 = vmor %vm352_vm8, %vm353_vm7 }
 0x113   :  { %v235_v35 = vsel %vm937_vm3, %v623_v55, %v231_v15  ;;  %v358_v37 = vmul.f32 %v922_v19, %v357_v24  ;;  %634 = vrsqrt.f32 %v942_v28  ;;  %vm273_vm9 = vweird.f32 %v928_v23 }
 0x114   :  { %v268_v30 = vmul.f32 %v928_v23, %v267_v26  ;;  %v173_v34 = vpop.xlane.xlu2 %172  ;;  %v386_v50 = vmul.f32 %v235_v35, %v834_v22  ;;  %v349_v55 = vmul.f32 0.5, %v348_v29  ;;  %v394_v22 = vmul.f32 %v315_v44, %v832_v21  ;;  %vm1016_vm13 = vmor %vm272_vm6, %vm273_vm9 }
 0x115   :  { %v175_v38 = vpop.xlane.xlu0 %174  ;;  %v199_v39 = vmul.f32 0.0078125, %v173_v34  ;;  %v191_v40 = vpop.xlane.xlu1 %190  ;;  %v359_v62 = vmul.f32 0.5, %v358_v37  ;;  %vm242_vm10 = vweird.f32 %v942_v28  ;;  %vm363_vm12 = vweird.f32 %v922_v19 }
 0x116   :  { %v269_v41 = vmul.f32 0.5, %v268_v30  ;;  %v200_v43 = vmul.f32 0.0078125, %v175_v38  ;;  %v208_v49 = vmul.f32 0.0078125, %v191_v40  ;;  %v406_v8 = vmul.f32 %v962_v51, %v386_v50 }
 0x117   :  { %v957_v45 = vpop.eup %630  ;;  %v959_v48 = vadd.f32 1e-05, %v199_v39  ;;  %v350_v9 = vsub.f32 1.5, %v349_v55  ;;  %v360_v20 = vsub.f32 1.5, %v359_v62  ;;  %v414_v24 = vmul.f32 %v962_v51, %v394_v22 }
 0x118   :  { %v317_v56 = vmul.f32 %v957_v45, %v920_v17  ;;  %v966_v61 = vpop.eup %632  ;;  %v968_v63 = vadd.f32 1e-05, %v200_v43  ;;  %v270_v1 = vsub.f32 1.5, %v269_v41  ;;  %v985_v5 = vadd.f32 1e-05, %v208_v49 }
 0x119   :  { %636 = vrsqrt.f32 %v959_v48  ;;  %v327_v3 = vmul.f32 %v966_v61, %v926_v14  ;;  %v981_v4 = vpop.eup %634  ;;  %v426_v15 = vadd.f32 %v974_v53, %v406_v8  ;;  %v434_v36 = vadd.f32 %v974_v53, %v414_v24 }
 0x11a   :  { %v318_v2 = vmul.f32 %v957_v45, %v317_v56  ;;  %638 = vrsqrt.f32 %v968_v63  ;;  %v237_v12 = vmul.f32 %v981_v4, %v942_v28  ;;  %v271_v27 = vmul.f32 %v928_v23, %v270_v1 }
 0x11b   :  { %v328_v10 = vmul.f32 %v966_v61, %v327_v3  ;;  %640 = vrsqrt.f32 %v985_v5  ;;  %478 = vmatmul.f32.vlgmr.msra.gmra.mxu0 %v426_v15  ;;  %v351_v44 = vmul.f32 %v918_v11, %v350_v9  ;;  %v1008_v49 = vmul.f32 %v922_v19, %v360_v20  ;;  %502 = vmatmul.f32.vlgmr.msra.gmra.mxu2 %v434_v36 }
 0x11c   :  { %v319_v21 = vmul.f32 0.5, %v318_v2  ;;  %v167_v18 = vpop.xlane.xlu2 %166  ;;  %v238_v29 = vmul.f32 %v981_v4, %v237_v12  ;;  %vm323_vm14 = vweird.f32 %v957_v45  ;;  %v275_v60 = vsel %vm1016_vm13, %v928_v23, %v271_v27 }
 0x11d   :  { %v169_v25 = vpop.xlane.xlu0 %168  ;;  %v185_v26 = vpop.xlane.xlu1 %184  ;;  %v196_v37 = vmul.f32 0.0078125, %v167_v18  ;;  %v329_v39 = vmul.f32 0.5, %v328_v10  ;;  %vm243_vm15 = vweird.f32 %v981_v4  ;;  %vm322_vm0 = vweird.f32 %v920_v17 }
 0x11e   :  { %v197_v30 = vmul.f32 0.0078125, %v169_v25  ;;  %v320_v35 = vsub.f32 1.5, %v319_v21  ;;  %v205_v38 = vmul.f32 0.0078125, %v185_v26  ;;  %v239_v40 = vmul.f32 0.5, %v238_v29  ;;  %vm1070_vm7 = vmor %vm242_vm10, %vm243_vm15 }
 0x11f   :  { %v998_v34 = vpop.eup %636  ;;  %v1022_v56 = vadd.f32 1e-05, %v196_v37  ;;  %v330_v9 = vsub.f32 1.5, %v329_v39  ;;  %vm332_vm1 = vweird.f32 %v926_v14  ;;  %vm333_vm2 = vweird.f32 %v966_v61  ;;  %vm1100_vm15 = vmor %vm362_vm11, %vm363_vm12 }
 0x120   :  { %v277_v41 = vmul.f32 %v998_v34, %v959_v48  ;;  %v1004_v43 = vpop.eup %638  ;;  %v1020_v55 = vadd.f32 1e-05, %v197_v30  ;;  %v240_v62 = vsub.f32 1.5, %v239_v40  ;;  %v1027_v1 = vadd.f32 1e-05, %v205_v38 }
 0x121   :  { %v287_v22 = vmul.f32 %v1004_v43, %v968_v63  ;;  %v1032_v2 = vpop.eup %640  ;;  %v1035_v3 = vmul.f32 %v957_v45, %v320_v35  ;;  %vm283_vm3 = vweird.f32 %v998_v34  ;;  %vm282_vm5 = vweird.f32 %v959_v48 }
 0x122   :  { %v278_v8 = vmul.f32 %v998_v34, %v277_v41  ;;  %642 = vrsqrt.f32 %v1020_v55  ;;  %v367_v21 = vmul.f32 %v1032_v2, %v985_v5  ;;  %v241_v12 = vmul.f32 %v981_v4, %v240_v62 }
 0x123   :  { %v288_v23 = vmul.f32 %v1004_v43, %v287_v22  ;;  %644 = vrsqrt.f32 %v1022_v56  ;;  %v390_v20 = vmul.f32 %v275_v60, %v844_v33  ;;  %v355_v26 = vsel %vm354_vm4, %v918_v11, %v351_v44  ;;  %vm1126_vm4 = vmor %vm282_vm5, %vm283_vm3 }
 0x124   :  { %v193_v10 = vpop.xlane.xlu2 %192  ;;  %v279_v18 = vmul.f32 0.5, %v278_v8  ;;  %v368_v25 = vmul.f32 %v1032_v2, %v367_v21  ;;  %646 = vrsqrt.f32 %v1027_v1  ;;  %v398_v29 = vmul.f32 %v355_v26, %v842_v32 }
 0x125   :  { %v177_v15 = vpop.xlane.xlu1 %176  ;;  %v289_v24 = vmul.f32 0.5, %v288_v23  ;;  %v410_v54 = vmul.f32 %v962_v51, %v390_v20  ;;  %v209_v30 = vmul.f32 0.0078125, %v193_v10  ;;  %v1061_v35 = vmul.f32 %v966_v61, %v330_v9 }
 0x126   :  { %v280_v27 = vsub.f32 1.5, %v279_v18  ;;  %vm292_vm6 = vweird.f32 %v968_v63  ;;  %v369_v33 = vmul.f32 0.5, %v368_v25  ;;  %v201_v37 = vmul.f32 0.0078125, %v177_v15 }
 0x127   :  { %v290_v36 = vsub.f32 1.5, %v289_v24  ;;  %vm293_vm8 = vweird.f32 %v1004_v43  ;;  %vm372_vm9 = vweird.f32 %v985_v5  ;;  %v430_v32 = vadd.f32 %v974_v53, %v410_v54 }
 0x128   :  { %v1064_v38 = vpop.eup %642  ;;  %v418_v39 = vmul.f32 %v962_v51, %v398_v29  ;;  %v1078_v40 = vadd.f32 1e-05, %v209_v30  ;;  %v370_v41 = vsub.f32 1.5, %v369_v33  ;;  %vm373_vm13 = vweird.f32 %v1032_v2  ;;  %vm1170_vm3 = vmor %vm292_vm6, %vm293_vm8 }
 0x129   :  { %v257_v28 = vmul.f32 %v1064_v38, %v1020_v55  ;;  %v245_v44 = vsel %vm1070_vm7, %v981_v4, %v241_v12  ;;  %v1087_v50 = vpop.eup %644  ;;  %v281_v62 = vmul.f32 %v998_v34, %v280_v27  ;;  %490 = vmatmul.f32.vlgmr.msra.gmra.mxu1 %v430_v32  ;;  %v1092_v60 = vadd.f32 1e-05, %v201_v37  ;;  %vm324_vm7 = vmor %vm322_vm0, %vm323_vm14 }
 0x12a   :  { %v438_v22 = vadd.f32 %v974_v53, %v418_v39  ;;  %648 = vrsqrt.f32 %v1078_v40  ;;  %v1094_v8 = vpop.eup %646  ;;  %v1105_v4 = vmul.f32 %v1004_v43, %v290_v36  ;;  %v247_v21 = vmul.f32 %v1087_v50, %v1022_v56  ;;  %vm1138_vm14 = vmor %vm332_vm1, %vm333_vm2 }
 0x12b   :  { %v258_v23 = vmul.f32 %v1064_v38, %v257_v28  ;;  %v371_v57 = vmul.f32 %v1032_v2, %v370_v41  ;;  %vm252_vm11 = vweird.f32 %v1022_v56  ;;  %vm253_vm12 = vweird.f32 %v1087_v50  ;;  %vm1181_vm5 = vmor %vm372_vm9, %vm373_vm13 }
 0x12c   :  { %v337_v10 = vmul.f32 %v1094_v8, %v1027_v1  ;;  %vm342_vm10 = vweird.f32 %v1027_v1  ;;  %514 = vmatmul.f32.vlgmr.msra.gmra.mxu3 %v438_v22  ;;  %650 = vrsqrt.f32 %v1092_v60  ;;  %v248_v18 = vmul.f32 %v1087_v50, %v247_v21  ;;  %vm254_vm13 = vmor %vm252_vm11, %vm253_vm12 }
 0x12d   :  { %v259_v12 = vmul.f32 0.5, %v258_v23  ;;  %v387_v20 = vmul.f32 %v245_v44, %v857_v47  ;;  %v325_v15 = vsel %vm324_vm7, %v957_v45, %v1035_v3  ;;  %v365_v47 = vsel %vm1100_vm15, %v922_v19, %v1008_v49 }
 0x12e   :  { %v338_v48 = vmul.f32 %v1094_v8, %v337_v10  ;;  %v395_v25 = vmul.f32 %v325_v15, %v853_v42  ;;  %v285_v45 = vsel %vm1126_vm4, %v998_v34, %v281_v62  ;;  %v249_v26 = vmul.f32 0.5, %v248_v18 }
 0x12f   :  { %v260_v3 = vsub.f32 1.5, %v259_v12  ;;  %v407_v14 = vmul.f32 %v962_v51, %v387_v20  ;;  %v399_v27 = vmul.f32 %v365_v47, %v840_v31  ;;  %vm343_vm0 = vweird.f32 %v1094_v8 }
 0x130   :  { %v1153_v54 = vpop.eup %648  ;;  %v339_v29 = vmul.f32 0.5, %v338_v48  ;;  %v415_v42 = vmul.f32 %v962_v51, %v395_v25  ;;  %v391_v30 = vmul.f32 %v285_v45, %v866_v52  ;;  %v250_v19 = vsub.f32 1.5, %v249_v26  ;;  %vm1220_vm4 = vmor %vm342_vm10, %vm343_vm0 }
 0x131   :  { %v377_v49 = vmul.f32 %v1153_v54, %v1078_v40  ;;  %vm382_vm1 = vweird.f32 %v1078_v40  ;;  %vm302_vm2 = vweird.f32 %v1092_v60  ;;  %v335_v31 = vsel %vm1138_vm14, %v966_v61, %v1061_v35 }
 0x132   :  { %v651_v34 = vpop.eup %650  ;;  %v340_v36 = vsub.f32 1.5, %v339_v29  ;;  %v427_v33 = vadd.f32 %v974_v53, %v407_v14  ;;  %v435_v37 = vadd.f32 %v974_v53, %v415_v42  ;;  %v419_v11 = vmul.f32 %v962_v51, %v399_v27 }
 0x133   :  { %v261_v63 = vmul.f32 %v1064_v38, %v260_v3  ;;  %v251_v35 = vmul.f32 %v1087_v50, %v250_v19  ;;  %v378_v32 = vmul.f32 %v1153_v54, %v377_v49  ;;  %v297_v39 = vmul.f32 %v651_v34, %v1092_v60 }
 0x134   :  { %vm1293_vm6 = vweird.f32 %v1064_v38  ;;  %vm1294_vm8 = vweird.f32 %v1020_v55  ;;  %v341_v5 = vmul.f32 %v1094_v8, %v340_v36  ;;  %vm383_vm9 = vweird.f32 %v1153_v54  ;;  %481 = vmatmul.f32.gmra.mxu0 %v427_v33  ;;  %505 = vmatmul.f32.gmra.mxu2 %v435_v37 }
 0x135   :  { %vm1193_vm15 = vmor %vm1294_vm8, %vm1293_vm6  ;;  %v439_v28 = vadd.f32 %v974_v53, %v419_v11  ;;  %v411_v44 = vmul.f32 %v962_v51, %v391_v30  ;;  %v379_v55 = vmul.f32 0.5, %v378_v32  ;;  %v298_v62 = vmul.f32 %v651_v34, %v297_v39 }
 0x136   :  { %v396_v22 = vmul.f32 %v335_v31, %v855_v46  ;;  %v375_v9 = vsel %vm1181_vm5, %v1032_v2, %v371_v57  ;;  %v255_v10 = vsel %vm254_vm13, %v1087_v50, %v251_v35  ;;  %v295_v56 = vsel %vm1170_vm3, %v1004_v43, %v1105_v4  ;;  %vm384_vm7 = vmor %vm382_vm1, %vm383_vm9 }
 0x137   :  { %517 = vmatmul.f32.gmra.mxu3 %v439_v28  ;;  %v431_v23 = vadd.f32 %v974_v53, %v411_v44  ;;  %v400_v21 = vmul.f32 %v375_v9, %v872_v59  ;;  %v380_v2 = vsub.f32 1.5, %v379_v55  ;;  %v299_v57 = vmul.f32 0.5, %v298_v62 }
 0x138   :  { %v416_v17 = vmul.f32 %v962_v51, %v396_v22  ;;  %v388_v59 = vmul.f32 %v255_v10, %v881_v0  ;;  %v392_v12 = vmul.f32 %v295_v56, %v869_v58  ;;  %v345_v43 = vsel %vm1220_vm4, %v1094_v8, %v341_v5 }
 0x139   :  { %493 = vmatmul.f32.gmra.mxu1 %v431_v23  ;;  %v420_v50 = vmul.f32 %v962_v51, %v400_v21  ;;  %v265_v1 = vsel %vm1193_vm15, %v1064_v38, %v261_v63  ;;  %v381_v4 = vmul.f32 %v1153_v54, %v380_v2  ;;  %v300_v18 = vsub.f32 1.5, %v299_v57 }
 0x13a   :  { %vm303_vm10 = vweird.f32 %v651_v34  ;;  %v408_v20 = vmul.f32 %v962_v51, %v388_v59  ;;  %v436_v58 = vadd.f32 %v974_v53, %v416_v17  ;;  %v412_v8 = vmul.f32 %v962_v51, %v392_v12 }
 0x13b   :  { %v440_v0 = vadd.f32 %v974_v53, %v420_v50  ;;  %v397_v15 = vmul.f32 %v345_v43, %v887_v7  ;;  %v301_v38 = vmul.f32 %v651_v34, %v300_v18  ;;  %v389_v48 = vmul.f32 %v265_v1, %v884_v6  ;;  %vm304_vm11 = vmor %vm302_vm2, %vm303_vm10 }
 0x13c   :  { %v428_v24 = vadd.f32 %v974_v53, %v408_v20  ;;  %v385_v25 = vsel %vm384_vm7, %v1153_v54, %v381_v4  ;;  %508 = vmatmul.f32.gmra.mxu2 %v436_v58  ;;  %v432_v7 = vadd.f32 %v974_v53, %v412_v8 }
 0x13d   :  { %v417_v40 = vmul.f32 %v962_v51, %v397_v15  ;;  %v401_v47 = vmul.f32 %v385_v25, %v896_v16  ;;  %v305_v45 = vsel %vm304_vm11, %v651_v34, %v301_v38  ;;  %v409_v6 = vmul.f32 %v962_v51, %v389_v48 }
 0x13e   :  { %484 = vmatmul.f32.gmra.mxu0 %v428_v24  ;;  %v393_v3 = vmul.f32 %v305_v45, %v899_v13  ;;  %v619_v13 = vld [vmem:[%s1273_s4] ss:$0 sm:$0xff]  ;;  %s759_s4 = smov [#allocation8]  }
 0x13f   :  { %520 = vmatmul.f32.gmra.mxu3 %v440_v0  ;;  %v421_v26 = vmul.f32 %v962_v51, %v401_v47  ;;  %v437_v60 = vadd.f32 %v974_v53, %v417_v40  ;;  %v429_v16 = vadd.f32 %v974_v53, %v409_v6  ;;  %s547_s10 = sshll.u32 %s759_s4, 4  ;;  %s548_s10 = int_to_ptr.vmem [resolvable:$true] %s547_s10 }
 0x140   :  { %v413_v14 = vmul.f32 %v962_v51, %v393_v3 }
 0x141   :  { %496 = vmatmul.f32.gmra.mxu1 %v432_v7  ;;  %v441_v27 = vadd.f32 %v974_v53, %v421_v26 }
 0x142   :  { %v433_v54 = vadd.f32 %v974_v53, %v413_v14 }
 0x144   :  { %511 = vmatmul.f32.gmra.mxu2 %v437_v60 }
 0x146   :  { %487 = vmatmul.f32.gmra.mxu0 %v429_v16 }
 0x147   :  { %523 = vmatmul.f32.gmra.mxu3 %v441_v27 }
 0x149   :  { %499 = vmatmul.f32.gmra.mxu1 %v433_v54 }
 0x198   :  { %v479_v29 = vpop.f32.mrf.mxu0 }
 0x199   :  { %v480_v42 = vadd.f32 %v619_v13, %v479_v29 }
 0x19b   :  { %527 = vst [vmem:[#allocation8] sm:$0xff] %v480_v42 }
 0x19e   :  { %v503_v30 = vpop.f32.mrf.mxu2 }
 0x19f   :  { %v504_v19 = vadd.f32 %v619_v13, %v503_v30 }
 0x1a1   :  { %535 = vst [vmem:[#allocation8 + $0x40] sm:$0xff] %v504_v19 }
 0x1a6   :  { %v491_v51 = vpop.f32.mrf.mxu1 }
 0x1a7   :  { %v492_v49 = vadd.f32 %v619_v13, %v491_v51 }
 0x1a9   :  { %531 = vst [vmem:[#allocation8 + $0x20] sm:$0xff] %v492_v49 }
 0x1af   :  { %v515_v31 = vpop.f32.mrf.mxu3 }
 0x1b0   :  { %v516_v34 = vadd.f32 %v619_v13, %v515_v31 }
 0x1b1   :  { %v482_v52 = vpop.f32.mrf.mxu0 }
 0x1b2   :  { %539 = vst [vmem:[#allocation8 + $0x60] sm:$0xff] %v516_v34  ;;  %v483_v53 = vadd.f32 %v619_v13, %v482_v52 }
 0x1b4   :  { %528 = vst [vmem:[#allocation8 + $0x8] sm:$0xff] %v483_v53 }
 0x1b6   :  { %v494_v36 = vpop.f32.mrf.mxu1 }
 0x1b7   :  { %v495_v33 = vadd.f32 %v619_v13, %v494_v36  ;;  %v506_v37 = vpop.f32.mrf.mxu2 }
 0x1b8   :  { %v507_v11 = vadd.f32 %v619_v13, %v506_v37 }
 0x1b9   :  { %532 = vst [vmem:[#allocation8 + $0x28] sm:$0xff] %v495_v33 }
 0x1ba   :  { %v518_v61 = vpop.f32.mrf.mxu3  ;;  %536 = vst [vmem:[#allocation8 + $0x48] sm:$0xff] %v507_v11 }
 0x1bb   :  { %v519_v63 = vadd.f32 %v619_v13, %v518_v61  ;;  %v485_v35 = vpop.f32.mrf.mxu0 }
 0x1bc   :  { %v486_v32 = vadd.f32 %v619_v13, %v485_v35 }
 0x1bd   :  { %540 = vst [vmem:[#allocation8 + $0x68] sm:$0xff] %v519_v63 }
 0x1be   :  { %529 = vst [vmem:[#allocation8 + $0x10] sm:$0xff] %v486_v32  ;;  %v497_v39 = vpop.f32.mrf.mxu1 }
 0x1bf   :  { %v498_v41 = vadd.f32 %v619_v13, %v497_v39  ;;  %v509_v5 = vpop.f32.mrf.mxu2 }
 0x1c0   :  { %v510_v28 = vadd.f32 %v619_v13, %v509_v5 }
 0x1c1   :  { %533 = vst [vmem:[#allocation8 + $0x30] sm:$0xff] %v498_v41 }
 0x1c2   :  { %v521_v44 = vpop.f32.mrf.mxu3  ;;  %537 = vst [vmem:[#allocation8 + $0x50] sm:$0xff] %v510_v28 }
 0x1c3   :  { %v522_v55 = vadd.f32 %v619_v13, %v521_v44  ;;  %v488_v62 = vpop.f32.mrf.mxu0 }
 0x1c4   :  { %v489_v22 = vadd.f32 %v619_v13, %v488_v62 }
 0x1c5   :  { %541 = vst [vmem:[#allocation8 + $0x70] sm:$0xff] %v522_v55 }
 0x1c6   :  { %530 = vst [vmem:[#allocation8 + $0x18] sm:$0xff] %v489_v22  ;;  %v500_v9 = vpop.f32.mrf.mxu1 }
 0x1c7   :  { %v501_v23 = vadd.f32 %v619_v13, %v500_v9  ;;  %v512_v21 = vpop.f32.mrf.mxu2 }
 0x1c8   :  { %v513_v10 = vadd.f32 %v619_v13, %v512_v21 }
 0x1c9   :  { %534 = vst [vmem:[#allocation8 + $0x38] sm:$0xff] %v501_v23 }
 0x1ca   :  { %v524_v56 = vpop.f32.mrf.mxu3  ;;  %538 = vst [vmem:[#allocation8 + $0x58] sm:$0xff] %v513_v10 }
 0x1cb   :  { %v525_v46 = vadd.f32 %v619_v13, %v524_v56 }
 0x1cd   :  { %542 = vst [vmem:[#allocation8 + $0x78] sm:$0xff] %v525_v46 }
 0x1ce   :  { %555 = dma.vmem_to_hbm [thread:$0]  %s548_s10, 2048, %s550_s13, [#allocation4], %s756_s28, %s756_s28, %s757_s29  }
 0x1cf   :  { %752 = dma.done.wait [#allocation4], 2048  }
 0x1d0   :  { %753 = vsyncadd [#allocation4], 4294965248 }
 0x1d1   :  { %560 = vsyncpa [#allocation3], 1 }
 0x1d2   :  { %561 = vsyncpa [#allocation6], 1 }
 0x1d3   :  { %562 = vsyncpa [#allocation4], 1 }

</bundles_post_ra>
